<compile_context>
chip_gen: v6e
topology: v6e:2x2x1
jax: 0.10.0
libtpu: 0.0.40
codegen_flags: <defaults>
</compile_context>

<pallas_src>
import functools

import numpy as np
import jax
import jax.numpy as jnp
from jax import lax
from jax.experimental import pallas as pl
from jax.experimental.pallas import tpu as pltpu


# ----------------------------------------------------------------------------
# Deterministic parameter construction (numpy only; replicates scipy window)
# ----------------------------------------------------------------------------
def _blackmanharris(N):
    # symmetric (fftbins=False) 4-term Blackman-Harris window
    if N == 1:
        return np.ones(1)
    n = np.arange(N)
    a0, a1, a2, a3 = 0.35875, 0.48829, 0.14128, 0.01168
    x = 2.0 * np.pi * n / (N - 1)
    return a0 - a1 * np.cos(x) + a2 * np.cos(2 * x) - a3 * np.cos(3 * x)


def create_cqt_kernel(Q, fs, fmin, n_bins, bins_per_octave=12):
    n_bins = int(n_bins)
    bins_per_octave = int(bins_per_octave)
    freqs = fmin * 2.0 ** (np.arange(n_bins) / float(bins_per_octave))
    lengths = np.ceil(Q * fs / freqs)
    max_len = int(lengths[0])
    if max_len % 2 == 0:
        max_len += 1
    temp = np.zeros((n_bins, max_len), dtype=np.complex64)
    for k in range(n_bins):
        l = int(lengths[k])
        start = (max_len - l) // 2
        window = _blackmanharris(l)
        temp[k, start:start + l] = (
            window / np.sum(window)
            * np.exp(1j * 2 * np.pi * np.r_[-l // 2 + 1: l // 2 + 1]
                     * freqs[k] / fs))
    return temp, max_len


def _next_pow2(n):
    return 1 if n <= 1 else 1 << (int(n) - 1).bit_length()


class CQTParams:
    """Mirrors CQT.__init__ and pre-packs the kernel bank for the TPU kernel."""

    # MXU row depth used for q-stacking (256 on v6e/v7x; harmless on v5e where
    # the compiler simply splits a 256-row operand into two 128-row passes).
    _MXU_ROWS = 256

    def __init__(self, fs, fmin, n_bins, bins_per_octave, hop, filter_scale=1):
        self.fs = fs
        self.fmin = float(fmin)
        self.n_bins = int(n_bins)
        self.bins_per_octave = int(bins_per_octave)
        self.hop = int(hop)
        Q = float(filter_scale) / (2 ** (1.0 / bins_per_octave) - 1)
        kern_c, self.width = create_cqt_kernel(Q, fs, fmin, self.n_bins,
                                               self.bins_per_octave)
        # (C, W): real rows then imag rows — same ordering as torch.cat
        kern = np.concatenate([np.real(kern_c), np.imag(kern_c)],
                              axis=0).astype(np.float32)
        self.cqt_kernels = jnp.asarray(kern)              # f32, reference path
        C, W = kern.shape
        self.n_ch = C
        self.nq = -(-W // self.hop)                       # ceil(W / hop)
        self.halo = max(8, _next_pow2(self.nq - 1))       # halo rows per tile
        self.c_pad = -(-C // 8) * 8                       # sublane-aligned C
        # number of hop-taps stacked along the MXU row axis per matmul
        self.group = min(self.nq, max(1, self._MXU_ROWS // self.c_pad))
        self.n_groups = -(-self.nq // self.group)
        # kq_stacked[gi, qq*c_pad + c, r] = K[c, (gi*group + qq)*hop + r]
        k_pad = np.zeros((self.c_pad, self.n_groups * self.group * self.hop),
                         np.float32)
        k_pad[:C, :W] = kern
        kstack = np.zeros((self.n_groups, self.group * self.c_pad, self.hop),
                          np.float32)
        for q in range(self.n_groups * self.group):
            gi, qq = divmod(q, self.group)
            kstack[gi, qq * self.c_pad:(qq + 1) * self.c_pad, :] = \
                k_pad[:, q * self.hop:(q + 1) * self.hop]
        # bf16 weights: native MXU dtype, half the HBM / VMEM bytes
        self.kq_stacked = jnp.asarray(kstack, dtype=jnp.bfloat16)


# ----------------------------------------------------------------------------
# Pallas kernel: one frame-tile of the strided CQT conv
# ----------------------------------------------------------------------------
def _cqt_conv_kernel(base_ref, halo_ref, kq_ref, out_ref, *,
                     nq, n_ch, c_pad, group):
    # base_ref: (tm, hop)  f32 audio rows of this tile (row j = frame j)
    # halo_ref: (h,  hop)  f32 first rows of the NEXT tile (frame overlap)
    # kq_ref:   (n_groups, group*c_pad, hop) bf16 stacked CQT kernels
    # out_ref:  (n_ch, tm) f32 lane-dense output tile
    tm = out_ref.shape[1]
    n_groups = kq_ref.shape[0]

    # Reorient in VMEM: frames go to the 128-lane axis (cheap XLU transpose),
    # then cast the MXU operand to bf16 (f32 accumulation below).
    rows = jnp.concatenate([base_ref[...], halo_ref[...]], axis=0)  # (tm+h, hop)
    slab = jnp.transpose(rows).astype(jnp.bfloat16)                 # (hop, tm+h)

    acc = None
    for gi in range(n_groups):                                      # static unroll
        # one fat matmul per q-group against the UNSHIFTED slab
        prod = jnp.dot(kq_ref[gi], slab,
                       preferred_element_type=jnp.float32)   # (group*c_pad, tm+h)
        for qq in range(group):
            q = gi * group + qq
            if q >= nq:
                break
            # frame shift applied on the small (n_ch, tm) product block
            blk = prod[qq * c_pad:qq * c_pad + n_ch, q:q + tm]
            acc = blk if acc is None else acc + blk
    out_ref[...] = acc


# ----------------------------------------------------------------------------
# Forward pass (glue: a single zero-pad in XLA, everything else in Pallas)
# ----------------------------------------------------------------------------
def audio_input(x):
    if x.ndim == 2:
        x = x[:, None, :]
    elif x.ndim == 1:
        x = x[None, None, :]
    elif x.ndim == 3:
        pass
    else:
        raise ValueError('Only support input with shape = (batch, len) or (len)')
    if x.shape[1] > 1:
        x = jnp.mean(x, axis=1, keepdims=True)
    return x


def _choose_frame_tile(T, frame_tile, halo):
    """Lane-dense frame tile: a multiple of max(128, halo) covering T frames."""
    align = max(128, halo)
    t_aligned = -(-T // align) * align
    tm = -(-max(int(frame_tile), 1) // align) * align
    tm = min(tm, t_aligned)
    n_tiles = -(-T // tm)
    return tm, n_tiles


def _make_cqt_call(p, B, tm, n_tiles, vmem_bytes, single_buffer_kq):
    hop, h = p.hop, p.halo
    stride = tm // h                      # halo block-index stride (units of h rows)
    kq_shape = tuple(p.kq_stacked.shape)
    kq_kwargs = {}
    if single_buffer_kq:
        # constant-index-map weights: one resident VMEM copy, no double buffer
        kq_kwargs = dict(pipeline_mode=pl.Buffered(1))
    kernel = functools.partial(_cqt_conv_kernel, nq=p.nq, n_ch=p.n_ch,
                               c_pad=p.c_pad, group=p.group)
    return pl.pallas_call(
        kernel,
        out_shape=jax.ShapeDtypeStruct((B, p.n_ch, tm * n_tiles), jnp.float32),
        grid=(B, n_tiles),
        in_specs=[
            # this tile's tm frame-rows (a fully contiguous HBM chunk)
            pl.BlockSpec((None, tm, hop), lambda b, i: (b, i, 0)),
            # the (nq-1)-row overlap, read as the first h rows of the NEXT tile
            pl.BlockSpec((None, h, hop), lambda b, i: (b, (i + 1) * stride, 0)),
            # resident stacked CQT kernel bank (bf16)
            pl.BlockSpec(kq_shape, lambda b, i: (0, 0, 0), **kq_kwargs),
        ],
        out_specs=pl.BlockSpec((None, p.n_ch, tm), lambda b, i: (b, 0, i)),
        compiler_params=pltpu.CompilerParams(
            # B * n_tiles should be even / large enough to balance v7x's 2 TCs
            dimension_semantics=("parallel", "parallel"),
            vmem_limit_bytes=vmem_bytes,
        ),
    )


def cqt_forward(x, p, frame_tile=1024):
    """Pallas-backed CQT forward: (B, L) -> (B, 2, n_bins, T)."""
    x = audio_input(x)
    x2 = x[:, 0, :].astype(jnp.float32)
    B, L = x2.shape
    W, hop, C, h = p.width, p.hop, p.n_ch, p.halo
    pad = W // 2
    Lp = L + 2 * pad
    T = (Lp - W) // hop + 1
    tm, n_tiles = _choose_frame_tile(T, frame_tile, h)
    t_pad = tm * n_tiles
    n_rows = t_pad + h                     # rows reachable by the last halo
    total = n_rows * hop

    # single zero-pad (conv padding + right pad to an exact number of rows);
    # everything after this is a free reshape.
    right = total - (L + pad)
    if right >= 0:
        xp = jnp.pad(x2, ((0, 0), (pad, right)))
    else:
        xp = jnp.pad(x2, ((0, 0), (pad, 0)))[:, :total]
    x_rows = xp.reshape(B, n_rows, hop)    # x_rows[b, j, r] = xp[b, j*hop + r]

    # VMEM budget: 2x(base+halo) f32 + 2x out f32 + kq bf16 + intermediates.
    est = (2 * (tm + h) * hop * 4 + 2 * C * tm * 4
           + 2 * int(np.prod(p.kq_stacked.shape)) * 2
           + hop * (tm + h) * 6 + p.group * p.c_pad * (tm + h) * 4 + C * tm * 4)
    vmem_bytes = int(max(32 * 1024 * 1024, min(2 * est, 48 * 1024 * 1024)))

    try:
        out = _make_cqt_call(p, B, tm, n_tiles, vmem_bytes, True)(
            x_rows, x_rows, p.kq_stacked)
    except Exception:
        # pl.Buffered(1) unavailable / rejected -> default double-buffered kq
        out = _make_cqt_call(p, B, tm, n_tiles, vmem_bytes, False)(
            x_rows, x_rows, p.kq_stacked)

    out = out[:, :, :T]                    # drop frame-tile padding
    return out.reshape(B, 2, p.n_bins, T)  # == torch .view(...)


# ----------------------------------------------------------------------------
# Pure-JAX reference (direct im2col conv, HIGHEST precision) for correctness
# ----------------------------------------------------------------------------
def cqt_forward_ref(x, p):
    x = audio_input(x)
    x2 = x[:, 0, :].astype(jnp.float32)
    B, L = x2.shape
    W, hop = p.width, p.hop
    pad = W // 2
    xp = jnp.pad(x2, ((0, 0), (pad, pad)))
    Lp = L + 2 * pad
    T = (Lp - W) // hop + 1
    idx = np.arange(T)[:, None] * hop + np.arange(W)[None, :]   # (T, W)
    frames = xp[:, idx]                                         # (B, T, W)
    out = jnp.einsum('btw,cw->bct', frames, p.cqt_kernels,
                     precision=lax.Precision.HIGHEST)           # (B, C, T)
    return out.reshape(B, 2, p.n_bins, T)


# ----------------------------------------------------------------------------
if __name__ == "__main__":
    key = jax.random.PRNGKey(0)
    k1, k2, k3 = jax.random.split(key, 3)

    # bf16 MXU operands with f32 accumulation -> tolerances derived for bf16
    RTOL, ATOL = 2e-2, 5e-3

    # 1) width=169 taps, hop=64, 24 bins; tiny input -> one 128-lane tile (T=16)
    p = CQTParams(fs=1000, fmin=100.0, n_bins=24, bins_per_octave=12, hop=64)
    x_small = jax.random.normal(k1, (2, 1024), dtype=jnp.float32)
    out_small = jax.block_until_ready(cqt_forward(x_small, p))
    ref_small = jax.block_until_ready(cqt_forward_ref(x_small, p))
    assert out_small.shape == (2, 2, p.n_bins, 16), out_small.shape
    np.testing.assert_allclose(np.asarray(out_small), np.asarray(ref_small),
                               rtol=RTOL, atol=ATOL)

    # 2) longer input, frame_tile=128 -> 2 lane-dense tiles (exercises the
    #    pipelined multi-tile grid + the cross-tile halo; T = 160)
    x_big = jax.random.normal(k2, (2, 10240), dtype=jnp.float32)
    out_big = jax.block_until_ready(cqt_forward(x_big, p, frame_tile=128))
    ref_big = jax.block_until_ready(cqt_forward_ref(x_big, p))
    assert out_big.shape == (2, 2, p.n_bins, 160), out_big.shape
    np.testing.assert_allclose(np.asarray(out_big), np.asarray(ref_big),
                               rtol=RTOL, atol=ATOL)

    # 3) hop=16, 10 bins -> exercises C padded to a sublane multiple (20->24),
    #    multiple q-groups (nq=11, group=10) and a partially-filled last group
    p3 = CQTParams(fs=1000, fmin=100.0, n_bins=10, bins_per_octave=12, hop=16)
    x_mid = jax.random.normal(k3, (2, 2048), dtype=jnp.float32)
    out_mid = jax.block_until_ready(cqt_forward(x_mid, p3))
    ref_mid = jax.block_until_ready(cqt_forward_ref(x_mid, p3))
    assert out_mid.shape == (2, 2, p3.n_bins, 128), out_mid.shape
    np.testing.assert_allclose(np.asarray(out_mid), np.asarray(ref_mid),
                               rtol=RTOL, atol=ATOL)

    print("KERNEL_OK")
</pallas_src>

<mosaic_0001>
module attributes {stable_mosaic.version = 11 : i64} {
  func.func @_cqt_conv_kernel(%arg0: i32, %arg1: i32, %arg2: memref<1x128x64xf32, #tpu.memory_space<vmem>>, %arg3: memref<1x8x64xf32, #tpu.memory_space<vmem>>, %arg4: memref<1x144x64xbf16, #tpu.memory_space<vmem>>, %arg5: memref<1x48x128xf32, #tpu.memory_space<vmem>>) attributes {dimension_semantics = [#tpu.dimension_semantics<parallel>, #tpu.dimension_semantics<parallel>], iteration_bounds = array<i64: 2, 1>, scalar_prefetch = 0 : i64, scratch_operands = 0 : i64, tpu.core_type = #tpu.core_type<tc>, window_params = [{transform_indices = @transform_0, window_bounds = array<i64: 1, 128, 64>}, {transform_indices = @transform_1, window_bounds = array<i64: 1, 8, 64>}, {pipeline_mode = #tpu.pipeline_mode<synchronous>, transform_indices = @transform_2, window_bounds = array<i64: 1, 144, 64>}, {transform_indices = @transform_3, window_bounds = array<i64: 1, 48, 128>}]} {
    %c0 = arith.constant 0 : index
    %c0_0 = arith.constant 0 : index
    %c0_1 = arith.constant 0 : index
    %0 = vector.load %arg2[%c0, %c0_0, %c0_1] : memref<1x128x64xf32, #tpu.memory_space<vmem>>, vector<1x128x64xf32>
    %1 = vector.shape_cast %0 : vector<1x128x64xf32> to vector<128x64xf32>
    %c0_2 = arith.constant 0 : index
    %c0_3 = arith.constant 0 : index
    %c0_4 = arith.constant 0 : index
    %2 = vector.load %arg3[%c0_2, %c0_3, %c0_4] : memref<1x8x64xf32, #tpu.memory_space<vmem>>, vector<1x8x64xf32>
    %3 = vector.shape_cast %2 : vector<1x8x64xf32> to vector<8x64xf32>
    %4 = tpu.concatenate %1, %3 in 0 : vector<128x64xf32>, vector<8x64xf32> -> vector<136x64xf32>
    %5 = tpu.transpose %4, [1, 0] : vector<136x64xf32> -> vector<64x136xf32>
    %6 = arith.truncf %5 : vector<64x136xf32> to vector<64x136xbf16>
    %c0_5 = arith.constant 0 : index
    %c0_6 = arith.constant 0 : index
    %c0_7 = arith.constant 0 : index
    %7 = vector.load %arg4[%c0_5, %c0_6, %c0_7] : memref<1x144x64xbf16, #tpu.memory_space<vmem>>, vector<1x144x64xbf16>
    %8 = vector.shape_cast %7 : vector<1x144x64xbf16> to vector<144x64xbf16>
    %cst = arith.constant dense<0.000000e+00> : vector<144x136xf32>
    %9 = tpu.matmul %8, %6, %cst {dimension_numbers = #tpu.dot_dimension_numbers<[1], [0], [0], [1], [0, 0, 1, 1], [], []>} : vector<144x64xbf16>, vector<64x136xbf16>, vector<144x136xf32> -> vector<144x136xf32>
    %10 = vector.extract_strided_slice %9 {offsets = [0, 0], sizes = [48, 128], strides = [1, 1]} : vector<144x136xf32> to vector<48x128xf32>
    %11 = vector.extract_strided_slice %9 {offsets = [48, 1], sizes = [48, 128], strides = [1, 1]} : vector<144x136xf32> to vector<48x128xf32>
    %12 = arith.addf %10, %11 : vector<48x128xf32>
    %13 = vector.extract_strided_slice %9 {offsets = [96, 2], sizes = [48, 128], strides = [1, 1]} : vector<144x136xf32> to vector<48x128xf32>
    %14 = arith.addf %12, %13 : vector<48x128xf32>
    %c0_8 = arith.constant 0 : index
    %c0_9 = arith.constant 0 : index
    %c0_10 = arith.constant 0 : index
    %15 = vector.load %arg5[%c0_8, %c0_9, %c0_10] : memref<1x48x128xf32, #tpu.memory_space<vmem>>, vector<1x48x128xf32>
    %16 = vector.shape_cast %15 : vector<1x48x128xf32> to vector<48x128xf32>
    %17 = vector.shape_cast %14 : vector<48x128xf32> to vector<1x48x128xf32>
    tpu.vector_store %arg5[%c0_8, %c0_9, %c0_10], %17 {strides = array<i32>} : memref<1x48x128xf32, #tpu.memory_space<vmem>>, vector<1x48x128xf32>,
    return
  }
  func.func @transform_0(%arg0: i32, %arg1: i32) -> (i32, i32, i32) {
    %c0_i32 = arith.constant 0 : i32
    %c0_i32_0 = arith.constant 0 : i32
    return %arg0, %arg1, %c0_i32 : i32, i32, i32
  }
  func.func @transform_1(%arg0: i32, %arg1: i32) -> (i32, i32, i32) {
    %c1_i32 = arith.constant 1 : i32
    %0 = arith.addi %arg1, %c1_i32 : i32
    %c16_i32 = arith.constant 16 : i32
    %1 = arith.muli %0, %c16_i32 : i32
    %c0_i32 = arith.constant 0 : i32
    %c0_i32_0 = arith.constant 0 : i32
    return %arg0, %1, %c0_i32 : i32, i32, i32
  }
  func.func @transform_2(%arg0: i32, %arg1: i32) -> (i32, i32, i32) {
    %c0_i32 = arith.constant 0 : i32
    %c0_i32_0 = arith.constant 0 : i32
    %c0_i32_1 = arith.constant 0 : i32
    %c0_i32_2 = arith.constant 0 : i32
    return %c0_i32, %c0_i32_0, %c0_i32_1 : i32, i32, i32
  }
  func.func @transform_3(%arg0: i32, %arg1: i32) -> (i32, i32, i32) {
    %c0_i32 = arith.constant 0 : i32
    %c0_i32_0 = arith.constant 0 : i32
    return %arg0, %c0_i32, %arg1 : i32, i32, i32
  }
}

module attributes {stable_mosaic.version = 11 : i64} {
  func.func @_cqt_conv_kernel(%arg0: i32, %arg1: i32, %arg2: memref<1x128x64xf32, #tpu.memory_space<vmem>>, %arg3: memref<1x8x64xf32, #tpu.memory_space<vmem>>, %arg4: memref<1x144x64xbf16, #tpu.memory_space<vmem>>, %arg5: memref<1x48x128xf32, #tpu.memory_space<vmem>>) attributes {dimension_semantics = [#tpu.dimension_semantics<parallel>, #tpu.dimension_semantics<parallel>], iteration_bounds = array<i64: 2, 1>, scalar_prefetch = 0 : i64, scratch_operands = 0 : i64, tpu.core_type = #tpu.core_type<tc>, window_params = [{transform_indices = @transform_0, window_bounds = array<i64: 1, 128, 64>}, {transform_indices = @transform_1, window_bounds = array<i64: 1, 8, 64>}, {pipeline_mode = #tpu.pipeline_mode<synchronous>, transform_indices = @transform_2, window_bounds = array<i64: 1, 144, 64>}, {transform_indices = @transform_3, window_bounds = array<i64: 1, 48, 128>}]} {
    %c0 = arith.constant 0 : index
    %c0_0 = arith.constant 0 : index
    %c0_1 = arith.constant 0 : index
    %0 = vector.load %arg2[%c0, %c0_0, %c0_1] : memref<1x128x64xf32, #tpu.memory_space<vmem>>, vector<1x128x64xf32>
    %1 = vector.shape_cast %0 : vector<1x128x64xf32> to vector<128x64xf32>
    %c0_2 = arith.constant 0 : index
    %c0_3 = arith.constant 0 : index
    %c0_4 = arith.constant 0 : index
    %2 = vector.load %arg3[%c0_2, %c0_3, %c0_4] : memref<1x8x64xf32, #tpu.memory_space<vmem>>, vector<1x8x64xf32>
    %3 = vector.shape_cast %2 : vector<1x8x64xf32> to vector<8x64xf32>
    %4 = tpu.concatenate %1, %3 in 0 : vector<128x64xf32>, vector<8x64xf32> -> vector<136x64xf32>
    %5 = tpu.transpose %4, [1, 0] : vector<136x64xf32> -> vector<64x136xf32>
    %6 = arith.truncf %5 : vector<64x136xf32> to vector<64x136xbf16>
    %c0_5 = arith.constant 0 : index
    %c0_6 = arith.constant 0 : index
    %c0_7 = arith.constant 0 : index
    %7 = vector.load %arg4[%c0_5, %c0_6, %c0_7] : memref<1x144x64xbf16, #tpu.memory_space<vmem>>, vector<1x144x64xbf16>
    %8 = vector.shape_cast %7 : vector<1x144x64xbf16> to vector<144x64xbf16>
    %cst = arith.constant dense<0.000000e+00> : vector<144x136xf32>
    %9 = tpu.matmul %8, %6, %cst {dimension_numbers = #tpu.dot_dimension_numbers<[1], [0], [0], [1], [0, 0, 1, 1], [], []>} : vector<144x64xbf16>, vector<64x136xbf16>, vector<144x136xf32> -> vector<144x136xf32>
    %10 = vector.extract_strided_slice %9 {offsets = [0, 0], sizes = [48, 128], strides = [1, 1]} : vector<144x136xf32> to vector<48x128xf32>
    %11 = vector.extract_strided_slice %9 {offsets = [48, 1], sizes = [48, 128], strides = [1, 1]} : vector<144x136xf32> to vector<48x128xf32>
    %12 = arith.addf %10, %11 : vector<48x128xf32>
    %13 = vector.extract_strided_slice %9 {offsets = [96, 2], sizes = [48, 128], strides = [1, 1]} : vector<144x136xf32> to vector<48x128xf32>
    %14 = arith.addf %12, %13 : vector<48x128xf32>
    %c0_8 = arith.constant 0 : index
    %c0_9 = arith.constant 0 : index
    %c0_10 = arith.constant 0 : index
    %15 = vector.load %arg5[%c0_8, %c0_9, %c0_10] : memref<1x48x128xf32, #tpu.memory_space<vmem>>, vector<1x48x128xf32>
    %16 = vector.shape_cast %15 : vector<1x48x128xf32> to vector<48x128xf32>
    %17 = vector.shape_cast %14 : vector<48x128xf32> to vector<1x48x128xf32>
    tpu.vector_store %arg5[%c0_8, %c0_9, %c0_10], %17 {strides = array<i32>} : memref<1x48x128xf32, #tpu.memory_space<vmem>>, vector<1x48x128xf32>,
    return
  }
  func.func @transform_0(%arg0: i32, %arg1: i32) -> (i32, i32, i32) {
    %c0_i32 = arith.constant 0 : i32
    %c0_i32_0 = arith.constant 0 : i32
    return %arg0, %arg1, %c0_i32 : i32, i32, i32
  }
  func.func @transform_1(%arg0: i32, %arg1: i32) -> (i32, i32, i32) {
    %c1_i32 = arith.constant 1 : i32
    %0 = arith.addi %arg1, %c1_i32 : i32
    %c16_i32 = arith.constant 16 : i32
    %1 = arith.muli %0, %c16_i32 : i32
    %c0_i32 = arith.constant 0 : i32
    %c0_i32_0 = arith.constant 0 : i32
    return %arg0, %1, %c0_i32 : i32, i32, i32
  }
  func.func @transform_2(%arg0: i32, %arg1: i32) -> (i32, i32, i32) {
    %c0_i32 = arith.constant 0 : i32
    %c0_i32_0 = arith.constant 0 : i32
    %c0_i32_1 = arith.constant 0 : i32
    %c0_i32_2 = arith.constant 0 : i32
    return %c0_i32, %c0_i32_0, %c0_i32_1 : i32, i32, i32
  }
  func.func @transform_3(%arg0: i32, %arg1: i32) -> (i32, i32, i32) {
    %c0_i32 = arith.constant 0 : i32
    %c0_i32_0 = arith.constant 0 : i32
    return %arg0, %c0_i32, %arg1 : i32, i32, i32
  }
}

</mosaic_0001>

<bundles_post_ra>
// kernel: tpu_custom_call.1
= control target key start
LH: loop header
LB: loop body
LE: loop exit
PB: predicated region body
PF: predicated region fallthrough
CT: control target
= control target key end

     0   :  { %8 = vsyncpa [#allocation3], 0  ;;  %s1253_s0 = inlined_call_operand.vmem [shape: f32[2,136,64], index: 0, kind: input, shape index: {}]   ;;  %s1254_s1 = inlined_call_operand.vmem [shape: f32[2,136,64], index: 1, kind: input, shape index: {}]   ;;  %s1255_s2 = inlined_call_operand.vmem [shape: bf16[1,144,64], index: 2, kind: input, shape index: {}]   ;;  %s1256_s3 = inlined_call_operand.hbm [shape: f32[2,48,128], index: 3, kind: output, shape index: {}]  }
   0x1   :  { %10 = vsyncpa [#allocation3 + $0x1], 0  ;;  %s1006_s12 = smov 0   ;;  %s1008_s13 = smov 0  }
   0x2   :  { %s1010_s14 = smov 0   ;;  %s1012_s15 = smov 0  }
   0x3   :  { %s1014_s16 = smov 0   ;;  %s1016_s17 = smov 0  }
   0x4 LB: > { %s789_s18 = sadd.s32 4294967295, %s978_s17   ;;  %s790_s19 = sadd.s32 4294967294, %s978_s17   ;;  %s978_s17 = sphi %s1016_s17, %s16_s17   ;;  %s974_s16 = sphi %s1014_s16, %s1263_s16   ;;  %s970_s15 = sphi %s1012_s15, %s1262_s15   ;;  %s966_s14 = sphi %s1010_s14, %s1261_s14   ;;  %s962_s13 = sphi %s1008_s13, %s1260_s13   ;;  %s958_s12 = sphi %s1006_s12, %s1259_s12  }
   0x5   : > { %s28_s20 = sadd.s32 1, %s974_s16  ;;  %s118_s21 = sadd.s32 1, %s966_s14 }
   0x6   : > { %p30_p0 = scmp.ge.s32.totalorder %s28_s20, 2  ;;  %p128_p1 = scmp.ne.s32.totalorder %s966_s14, %s962_s13 }
   0x7   : > { %p129_p2 = scmp.eq.s32.totalorder %s789_s18, 1  ;;  %p134_p3 = scmp.ne.s32.totalorder %s962_s13, %s958_s12 }
   0x8   : > { %s1265_s20 = smov (%p30_p0, %s28_s20), 0  ;;  %p135_p5 = scmp.eq.s32.totalorder %s790_s19, 1 }
   0x9   : > { %p1046_p4 = por %p129_p2, %p128_p1  ;;  %s113_s23 = ssub.s32 %s974_s16, %s1265_s20 }
   0xa   : > { %p793_p6 = scmp.ge.s32.totalorder %s978_s17, 1  ;;  %p116_p7 = scmp.eq.s32.totalorder %s113_s23, 0 }
   0xb   : > { %p1053_p8 = por %p135_p5, %p134_p3  ;;  %p192_p9 = scmp.lt.s32.totalorder %s978_s17, 3 }
   0xc   : > { %s1059_s25 = scalar_select %p116_p7, %s966_s14, %s118_s21  }
   0xd   : > { %p193_p10 = pnand %p793_p6, %p192_p9 }
   0xe   : > { %p239_p11 = scmp.lt.s32.totalorder (!%p193_p10), %s970_s15, 1  ;;  %s981_s9 = smov (!%p193_p10), 127  }
   0xf   : > { %196 = sbr.rel (%p193_p10) target bundleno = 646 (0x286), region = 32  ;;  %s982_s10 = smov (!%p193_p10), 126  }
  0x10   : > { %s231_s11 = sand.u32 (!%p193_p10), 1, %s962_s13   ;;  %s830_s21 = smul.u32 (!%p193_p10), 768, %s970_s15 }
  0x11   : > { %s827_s18 = smul.u32 (!%p193_p10), 48, %s231_s11  ;;  %s983_s30 = smov (!%p193_p10), [#allocation2]  }
  0x13   : > { %s1178_s19 = scalar_lea.vmem (!%p193_p10), [#allocation2], %s827_s18 }
  0x14   : > { %s240_s26 = scalar_select %p239_p11, %s970_s15, 1  ;;  %v980_v13 = vmov 0   ;;  %v893_v42 = vld [vmem:[%s1255_s2 + $0x28] sm:$0xff]   ;;  %v895_v43 = vld [vmem:[%s1255_s2] sm:$0xff]   ;;  %vm417_vm0 = vcmask 523264   ;;  %v894_v44 = vld [vmem:[%s1255_s2 + $0x30] sm:$0xff]  }
  0x15   : > { %521 = vmatprep.mubr.bf16.mxu1 %v980_v13  ;;  %477 = vmatprep.mubr.bf16.mxu0 %v980_v13  ;;  %v896_v45 = vld [vmem:[%s1255_s2 + $0x8] sm:$0xff]   ;;  %v897_v46 = vld [vmem:[%s1255_s2 + $0x38] sm:$0xff]   ;;  %v898_v47 = vld [vmem:[%s1255_s2 + $0x10] sm:$0xff]   ;;  %vm598_vm1 = vcmask 1039360   ;;  %vm653_vm2 = vcmask 1031168   ;;  %s693_s23 = sshll.u32 %s1178_s19, 4  ;;  %s1202_s23 = int_to_ptr.vmem [resolvable:$true] %s693_s23 }
  0x16   : > { %s828_s27 = smul.u32 136, %s240_s26  ;;  %v899_v48 = vld [vmem:[%s1255_s2 + $0x18] sm:$0xff]   ;;  %v900_v49 = vld [vmem:[%s1255_s2 + $0x40] sm:$0xff]   ;;  %s1208_s15 = scalar_lea.sflag [#allocation3], %s231_s11 }
  0x17   : > { %v901_v50 = vld [vmem:[%s1255_s2 + $0x20] sm:$0xff]   ;;  %s902_s29 = scalar_lea.vmem %s1202_s23, 768 }
  0x18   : > { %s818_s28 = sadd.s32 128, %s828_s27  ;;  %s1069_s7 = scalar_lea.vmem %s1253_s0, %s828_s27 }
  0x19   : > { %s261_s4 = scalar_lea.vmem %s1254_s1, %s818_s28  ;;  %v265_v1 = vld [vmem:[%s1069_s7] sm:$0xff]  ;;  %v266_v2 = vld [vmem:[%s1069_s7 + $0x8] sm:$0xff]  ;;  %v267_v3 = vld [vmem:[%s1069_s7 + $0x10] sm:$0xff]  ;;  %s1200_s28 = scalar_lea.hbm %s1256_s3, %s830_s21 }
  0x1a   : > { %v281_v0 = vld [vmem:[%s261_s4] sm:$0xff]  ;;  %v268_v4 = vld [vmem:[%s1069_s7 + $0x18] sm:$0xff]  ;;  %v270_v6 = vld [vmem:[%s1069_s7 + $0x28] sm:$0xff]  ;;  %p903_p12 = scmp.ne.s32.totalorder %s1202_s23, %s902_s29  ;;  %s906_s4 = sshll.u32 %s983_s30, 4  ;;  %s907_s4 = int_to_ptr.vmem [resolvable:$false] %s906_s4 }
  0x1b   : > { %314 = vxpose.xlu0.b32.start.end [1/1] (short) (narrow) %v281_v0, 64  ;;  %v269_v5 = vld [vmem:[%s1069_s7 + $0x20] sm:$0xff]  ;;  %v271_v7 = vld [vmem:[%s1069_s7 + $0x30] sm:$0xff]  ;;  %v272_v8 = vld [vmem:[%s1069_s7 + $0x38] sm:$0xff]  ;;  %s908_s5 = scalar_lea.vmem %s907_s4, 1536  ;;  %p909_p1 = scmp.lt.s32.totalorder %s1202_s23, %s907_s4 }
  0x1c   : > { %v273_v9 = vld [vmem:[%s1069_s7 + $0x40] sm:$0xff]  ;;  %v274_v10 = vld [vmem:[%s1069_s7 + $0x48] sm:$0xff]  ;;  %v275_v11 = vld [vmem:[%s1069_s7 + $0x50] sm:$0xff]  ;;  %p904_p13 = pnand %p903_p12, %p1046_p4  ;;  %p910_p2 = scmp.lt.s32.totalorder %s908_s5, %s902_s29 }
  0x1d   : > { %v276_v12 = vld [vmem:[%s1069_s7 + $0x58] sm:$0xff]  ;;  %v277_v14 = vld [vmem:[%s1069_s7 + $0x60] sm:$0xff]  ;;  %v278_v15 = vld [vmem:[%s1069_s7 + $0x68] sm:$0xff] }
  0x1e   : > { %v279_v16 = vld [vmem:[%s1069_s7 + $0x70] sm:$0xff]  ;;  %v280_v17 = vld [vmem:[%s1069_s7 + $0x78] sm:$0xff]  ;;  %p905_p0 = pneg %p904_p13  ;;  %p911_p3 = por %p910_p2, %p909_p1 }
  0x20   : > { %p912_p5 = pnand %p911_p3, %p905_p0 }
  0x38   : > { %282 = vxpose.xlu0.b32.start [1/16] (narrow) %v265_v1, 64 }
  0x3c   : > { %283 = vxpose.xlu0.b32.cont [2/16] (narrow) %v266_v2, 64 }
  0x40   : > { %284 = vxpose.xlu0.b32.cont [3/16] (narrow) %v267_v3, 64 }
  0x44   : > { %285 = vxpose.xlu0.b32.cont [4/16] (narrow) %v268_v4, 64 }
  0x48   : > { %286 = vxpose.xlu0.b32.cont [5/16] (narrow) %v269_v5, 64 }
  0x4c   : > { %287 = vxpose.xlu0.b32.cont [6/16] (narrow) %v270_v6, 64 }
  0x50   : > { %288 = vxpose.xlu0.b32.cont [7/16] (narrow) %v271_v7, 64 }
  0x54   : > { %289 = vxpose.xlu0.b32.cont [8/16] (narrow) %v272_v8, 64 }
  0x58   : > { %290 = vxpose.xlu0.b32.cont [9/16] (narrow) %v273_v9, 64 }
  0x5c   : > { %291 = vxpose.xlu0.b32.cont [10/16] (narrow) %v274_v10, 64 }
  0x60   : > { %292 = vxpose.xlu0.b32.cont [11/16] (narrow) %v275_v11, 64 }
  0x64   : > { %293 = vxpose.xlu0.b32.cont [12/16] (narrow) %v276_v12, 64 }
  0x68   : > { %294 = vxpose.xlu0.b32.cont [13/16] (narrow) %v277_v14, 64 }
  0x6c   : > { %295 = vxpose.xlu0.b32.cont [14/16] (narrow) %v278_v15, 64 }
  0x70   : > { %296 = vxpose.xlu0.b32.cont [15/16] (narrow) %v279_v16, 64 }
  0x74   : > { %297 = vxpose.xlu0.b32.end [16/16] (narrow) %v280_v17, 64 }
  0x97   : > { %v330_v18 = vpop.trf.xlu0 }
  0x9b   : > { %v331_v19 = vpop.trf.xlu0 }
  0x9c   : > { %v347_v20 = vpack.c.bf16 %v331_v19, %v330_v18 }
  0x9f   : > { %v332_v21 = vpop.trf.xlu0 }
  0xa3   : > { %v333_v22 = vpop.trf.xlu0 }
  0xa4   : > { %v349_v39 = vpack.c.bf16 %v333_v22, %v332_v21 }
  0xa7   : > { %v334_v23 = vpop.trf.xlu0 }
  0xab   : > { %v335_v24 = vpop.trf.xlu0 }
  0xac   : > { %v351_v37 = vpack.c.bf16 %v335_v24, %v334_v23 }
  0xaf   : > { %v336_v25 = vpop.trf.xlu0 }
  0xb3   : > { %v337_v26 = vpop.trf.xlu0 }
  0xb4   : > { %v353_v27 = vpack.c.bf16 %v337_v26, %v336_v25 }
  0xb6   : > { %453 = vmatprep.subr.bf16.mxu0 %v353_v27  ;;  %819 = vmatprep.subr.bf16.mxu1 %v353_v27 }
  0xb7   : > { %v298_v28 = vpop.trf.xlu0 }
  0xbb   : > { %v299_v29 = vpop.trf.xlu0 }
  0xbc   : > { %v346_v41 = vpack.c.bf16 %v299_v29, %v298_v28 }
  0xbf   : > { %v300_v30 = vpop.trf.xlu0 }
  0xc3   : > { %v301_v31 = vpop.trf.xlu0 }
  0xc4   : > { %v348_v40 = vpack.c.bf16 %v301_v31, %v300_v30 }
  0xc7   : > { %v302_v32 = vpop.trf.xlu0 }
  0xcb   : > { %v303_v33 = vpop.trf.xlu0 }
  0xcc   : > { %v350_v38 = vpack.c.bf16 %v303_v33, %v302_v32 }
  0xcf   : > { %v304_v34 = vpop.trf.xlu0 }
  0xd3   : > { %v305_v35 = vpop.trf.xlu0 }
  0xd4   : > { %v352_v36 = vpack.c.bf16 %v305_v35, %v304_v34 }
  0xd6   : > { %454 = vmatpush1.bf16.msra.mxu0 %v352_v36  ;;  %823 = vmatpush1.bf16.msra.mxu1 %v352_v36 }
  0xd7   : > { %455 = vmatprep.subr.bf16.mxu0 %v351_v37  ;;  %820 = vmatprep.subr.bf16.mxu1 %v351_v37 }
  0xda   : > { %456 = vmatpush1.bf16.msra.mxu0 %v350_v38  ;;  %824 = vmatpush1.bf16.msra.mxu1 %v350_v38 }
  0xdb   : > { %457 = vmatprep.subr.bf16.mxu0 %v349_v39  ;;  %821 = vmatprep.subr.bf16.mxu1 %v349_v39 }
  0xde   : > { %458 = vmatpush1.bf16.msra.mxu0 %v348_v40  ;;  %825 = vmatpush1.bf16.msra.mxu1 %v348_v40 }
  0xdf   : > { %459 = vmatprep.subr.bf16.mxu0 %v347_v20  ;;  %822 = vmatprep.subr.bf16.mxu1 %v347_v20 }
  0xe2   : > { %460 = vmatpush1.bf16.msra.mxu0 %v346_v41  ;;  %826 = vmatpush1.bf16.msra.mxu1 %v346_v41 }
  0xe5   : > { %810 = vmatmul.mubr.msk.bf16.vlgmr.msra.gmra.mxu1 %vm417_vm0, %v893_v42  ;;  %805 = vmatmul.mubr.msk.bf16.vlgmr.msra.gmra.mxu0 %vm417_vm0, %v895_v43 }
  0xe6   : > { %531 = vmatprep.mubr.bf16.mxu1 %v980_v13  ;;  %485 = vmatprep.mubr.bf16.mxu0 %v980_v13 }
  0xed   : > { %811 = vmatmul.mubr.msk.bf16.gmra.mxu1 %vm417_vm0, %v894_v44  ;;  %806 = vmatmul.mubr.msk.bf16.gmra.mxu0 %vm417_vm0, %v896_v45 }
  0xee   : > { %541 = vmatprep.mubr.bf16.mxu1 %v980_v13  ;;  %493 = vmatprep.mubr.bf16.mxu0 %v980_v13 }
  0xf5   : > { %812 = vmatmul.mubr.msk.bf16.gmra.mxu1 %vm417_vm0, %v897_v46  ;;  %807 = vmatmul.mubr.msk.bf16.gmra.mxu0 %vm417_vm0, %v898_v47 }
  0xf6   : > { %501 = vmatprep.mubr.bf16.mxu0 %v980_v13  ;;  %551 = vmatprep.mubr.bf16.mxu1 %v980_v13 }
  0xfd   : > { %808 = vmatmul.mubr.msk.bf16.gmra.mxu0 %vm417_vm0, %v899_v48  ;;  %813 = vmatmul.mubr.msk.bf16.gmra.mxu1 %vm417_vm0, %v900_v49 }
  0xfe   : > { %511 = vmatprep.mubr.bf16.mxu0 %v980_v13 }
 0x105   : > { %809 = vmatmul.mubr.msk.bf16.gmra.mxu0 %vm417_vm0, %v901_v50 }
 0x1a5   : > { %v523_v51 = vpop.f32.mrf.mxu1  ;;  %v1132_v52 = vpop.f32.mrf.mxu0 }
 0x1a6   : > { %590 = vrot.lane.b32.xlu1 %v523_v51, %s981_s9 }
 0x1a7   : > { %v481_v53 = vpop.f32.mrf.mxu0  ;;  %v525_v54 = vpop.f32.mrf.mxu1 }
 0x1a9   : > { %v1135_v55 = vpop.f32.mrf.mxu0  ;;  %v527_v57 = vpop.f32.mrf.mxu1 }
 0x1aa   : > { %592 = vrot.lane.b32.xlu1 %v525_v54, %s981_s9 }
 0x1ab   : > { %v484_v56 = vpop.f32.mrf.mxu0  ;;  %v529_v60 = vpop.f32.mrf.mxu1 }
 0x1ad   : > { %v1138_v58 = vpop.f32.mrf.mxu0  ;;  %v533_v63 = vpop.f32.mrf.mxu1 }
 0x1ae   : > { %594 = vrot.lane.b32.xlu1 %v527_v57, %s981_s9 }
 0x1af   : > { %v489_v59 = vpop.f32.mrf.mxu0  ;;  %v535_v2 = vpop.f32.mrf.mxu1 }
 0x1b1   : > { %v1141_v61 = vpop.f32.mrf.mxu0  ;;  %v537_v5 = vpop.f32.mrf.mxu1 }
 0x1b2   : > { %596 = vrot.lane.b32.xlu1 %v529_v60, %s981_s9 }
 0x1b3   : > { %v492_v62 = vpop.f32.mrf.mxu0  ;;  %v539_v6 = vpop.f32.mrf.mxu1 }
 0x1b5   : > { %v1144_v0 = vpop.f32.mrf.mxu0  ;;  %v543_v7 = vpop.f32.mrf.mxu1 }
 0x1b6   : > { %629 = vrot.lane.b32.xlu1 %v533_v63, %s982_s10 }
 0x1b7   : > { %v497_v1 = vpop.f32.mrf.mxu0  ;;  %v545_v8 = vpop.f32.mrf.mxu1 }
 0x1b9   : > { %v1147_v3 = vpop.f32.mrf.mxu0  ;;  %v547_v9 = vpop.f32.mrf.mxu1 }
 0x1ba   : > { %631 = vrot.lane.b32.xlu1 %v535_v2, %s982_s10 }
 0x1bb   : > { %v500_v4 = vpop.f32.mrf.mxu0  ;;  %v549_v10 = vpop.f32.mrf.mxu1 }
 0x1bd   : > { %v503_v11 = vpop.f32.mrf.mxu0  ;;  %v553_v12 = vpop.f32.mrf.mxu1 }
 0x1be   : > { %633 = vrot.lane.b32.xlu1 %v537_v5, %s982_s10 }
 0x1bf   : > { %v505_v13 = vpop.f32.mrf.mxu0  ;;  %v555_v14 = vpop.f32.mrf.mxu1 }
 0x1c1   : > { %v507_v15 = vpop.f32.mrf.mxu0  ;;  %v557_v16 = vpop.f32.mrf.mxu1 }
 0x1c2   : > { %635 = vrot.lane.b32.xlu1 %v539_v6, %s982_s10 }
 0x1c3   : > { %v509_v17 = vpop.f32.mrf.mxu0  ;;  %v559_v22 = vpop.f32.mrf.mxu1 }
 0x1c5   : > { %v513_v18 = vpop.f32.mrf.mxu0 }
 0x1c6   : > { %637 = vrot.lane.b32.xlu1 %v543_v7, %s982_s10 }
 0x1c7   : > { %v515_v19 = vpop.f32.mrf.mxu0 }
 0x1c9   : > { %v517_v20 = vpop.f32.mrf.mxu0 }
 0x1ca   : > { %639 = vrot.lane.b32.xlu1 %v545_v8, %s982_s10 }
 0x1cb   : > { %v519_v21 = vpop.f32.mrf.mxu0 }
 0x1ce   : > { %641 = vrot.lane.b32.xlu1 %v547_v9, %s982_s10 }
 0x1d2   : > { %643 = vrot.lane.b32.xlu1 %v549_v10, %s982_s10 }
 0x1d6   : > { %574 = vrot.lane.b32.xlu1 %v503_v11, %s981_s9 }
 0x1da   : > { %645 = vrot.lane.b32.xlu1 %v553_v12, %s982_s10 }
 0x1de   : > { %576 = vrot.lane.b32.xlu1 %v505_v13, %s981_s9 }
 0x1e2   : > { %647 = vrot.lane.b32.xlu1 %v555_v14, %s982_s10 }
 0x1e6   : > { %578 = vrot.lane.b32.xlu1 %v507_v15, %s981_s9 }
 0x1ea   : > { %649 = vrot.lane.b32.xlu1 %v557_v16, %s982_s10 }
 0x1ee   : > { %580 = vrot.lane.b32.xlu1 %v509_v17, %s981_s9 }
 0x1f2   : > { %582 = vrot.lane.b32.xlu1 %v513_v18, %s981_s9 }
 0x1f6   : > { %584 = vrot.lane.b32.xlu1 %v515_v19, %s981_s9 }
 0x1fa   : > { %586 = vrot.lane.b32.xlu1 %v517_v20, %s981_s9 }
 0x1fe   : > { %588 = vrot.lane.b32.xlu1 %v519_v21, %s981_s9 }
 0x202   : > { %651 = vrot.lane.b32.xlu1 %v559_v22, %s982_s10 }
 0x218   : > { %v591_v23 = vpop.permute.xlu1 %590 }
 0x21c   : > { %v593_v24 = vpop.permute.xlu1 %592 }
 0x21d   : > { %v603_v39 = vsel %vm598_vm1, %v591_v23, %v593_v24 }
 0x21e   : > { %v615_v43 = vadd.f32 %v603_v39, %v1144_v0 }
 0x220   : > { %v595_v25 = vpop.permute.xlu1 %594 }
 0x224   : > { %v597_v26 = vpop.permute.xlu1 %596 }
 0x225   : > { %v604_v27 = vsel %vm598_vm1, %v595_v25, %v597_v26 }
 0x228   : > { %v630_v28 = vpop.permute.xlu1 %629 }
 0x22c   : > { %v632_v29 = vpop.permute.xlu1 %631 }
 0x22d   : > { %v654_v42 = vsel %vm653_vm2, %v630_v28, %v632_v29 }
 0x230   : > { %v634_v30 = vpop.permute.xlu1 %633 }
 0x234   : > { %v636_v31 = vpop.permute.xlu1 %635 }
 0x235   : > { %v655_v53 = vsel %vm653_vm2, %v634_v30, %v636_v31 }
 0x238   : > { %v638_v32 = vpop.permute.xlu1 %637 }
 0x23c   : > { %v640_v33 = vpop.permute.xlu1 %639 }
 0x23d   : > { %v656_v62 = vsel %vm653_vm2, %v638_v32, %v640_v33 }
 0x240   : > { %v642_v34 = vpop.permute.xlu1 %641 }
 0x244   : > { %v644_v35 = vpop.permute.xlu1 %643 }
 0x245   : > { %v657_v4 = vsel %vm653_vm2, %v642_v34, %v644_v35 }
 0x248   : > { %v575_v36 = vpop.permute.xlu1 %574 }
 0x24c   : > { %v646_v37 = vpop.permute.xlu1 %645 }
 0x250   : > { %v577_v38 = vpop.permute.xlu1 %576 }
 0x251   : > { %v599_v40 = vsel %vm598_vm1, %v575_v36, %v577_v38 }
 0x252   : > { %v611_v41 = vadd.f32 %v599_v40, %v1132_v52 }
 0x254   : > { %v666_v44 = vadd.f32 %v654_v42, %v611_v41  ;;  %v648_v45 = vpop.permute.xlu1 %647 }
 0x255   : > { %v658_v46 = vsel %vm653_vm2, %v646_v37, %v648_v45 }
 0x256   : > { %672 = vst [vmem:[%s1178_s19] sm:$0xff] %v666_v44  ;;  %v670_v47 = vadd.f32 %v658_v46, %v615_v43 }
 0x258   : > { %676 = vst [vmem:[%s1178_s19 + $0x20] sm:$0xff] %v670_v47  ;;  %v579_v48 = vpop.permute.xlu1 %578 }
 0x25c   : > { %v650_v49 = vpop.permute.xlu1 %649 }
 0x260   : > { %v581_v50 = vpop.permute.xlu1 %580 }
 0x261   : > { %v600_v51 = vsel %vm598_vm1, %v579_v48, %v581_v50 }
 0x262   : > { %v612_v52 = vadd.f32 %v600_v51, %v1135_v55 }
 0x264   : > { %v667_v54 = vadd.f32 %v655_v53, %v612_v52  ;;  %v583_v56 = vpop.permute.xlu1 %582 }
 0x266   : > { %673 = vst [vmem:[%s1178_s19 + $0x8] sm:$0xff] %v667_v54 }
 0x268   : > { %v585_v57 = vpop.permute.xlu1 %584 }
 0x269   : > { %v601_v59 = vsel %vm598_vm1, %v583_v56, %v585_v57 }
 0x26a   : > { %v613_v60 = vadd.f32 %v601_v59, %v1138_v58  ;;  %v616_v58 = vadd.f32 %v604_v27, %v1147_v3 }
 0x26c   : > { %v668_v63 = vadd.f32 %v656_v62, %v613_v60  ;;  %v587_v0 = vpop.permute.xlu1 %586 }
 0x26e   : > { %674 = vst [vmem:[%s1178_s19 + $0x10] sm:$0xff] %v668_v63 }
 0x270   : > { %v589_v55 = vpop.permute.xlu1 %588 }
 0x271   : > { %v602_v1 = vsel %vm598_vm1, %v587_v0, %v589_v55 }
 0x272   : > { %v614_v2 = vadd.f32 %v602_v1, %v1141_v61 }
 0x274   : > { %v669_v5 = vadd.f32 %v657_v4, %v614_v2  ;;  %v652_v6 = vpop.permute.xlu1 %651 }
 0x275   : > { %v659_v7 = vsel %vm653_vm2, %v650_v49, %v652_v6 }
 0x276   : > { %675 = vst [vmem:[%s1178_s19 + $0x18] sm:$0xff] %v669_v5  ;;  %v671_v61 = vadd.f32 %v659_v7, %v616_v58 }
 0x278   : > { %677 = vst [vmem:[%s1178_s19 + $0x28] sm:$0xff] %v671_v61 }
 0x279   : > { %915 = shalt.err (!%p912_p5)
}
 0x27a   : > { %s916_s6 = scalar_lea.hbm %s1200_s28, 768  ;;  %s920_s9 = scalar_lea.hbm %s1256_s3, 1536 }
 0x27b   : > { %p917_p6 = scmp.ne.s32.totalorder %s1200_s28, %s916_s6  ;;  %p921_p10 = scmp.lt.s32.totalorder %s1200_s28, %s1256_s3 }
 0x27c   : > { %p922_p11 = scmp.lt.s32.totalorder %s920_s9, %s916_s6 }
 0x27d   : > { %p918_p7 = pnand %p917_p6, %p1046_p4 }
 0x27e   : > { %p923_p12 = por %p922_p11, %p921_p10 }
 0x27f   : > { %p919_p9 = pneg %p918_p7 }
 0x281   : > { %p924_p13 = pnand %p923_p12, %p919_p9 }
 0x283   : > { %927 = shalt.err (!%p924_p13)
}
 0x284   : > { %s984_s18 = smov 128   ;;  %s985_s19 = smov 8  }
 0x285   : > { %831 = dma.vmem_to_hbm [thread:$0]  (%p1046_p4), %s1202_s23, 768, %s1200_s28, %s1208_s15, %s984_s18, %s984_s18, %s985_s19  }
 0x286 PF: > { %p838_p0 = scmp.ge.s32.totalorder %s978_s17, 2  ;;  %s708_s21 = sand.u32 1, %s958_s12  }
 0x287   : > { %s709_s26 = scalar_lea.sflag [#allocation3], %s708_s21 }
 0x288   : > { %p834_p1 = pnand %p838_p0, %p1053_p8 }
 0x28a   : > { %p835_p2 = pneg %p834_p1 }
 0x28c   : > { %953 = dma.done.wait (%p835_p2), %s709_s26, 768  }
 0x28d   : > { %955 = vsyncadd (%p835_p2), %s709_s26, 4294966528  ;;  %s16_s17 = sadd.s32 1, %s978_s17   ;;  %s1259_s12 = smov %s962_s13 }
 0x28e   : > { %p13_p3 = scmp.ge.s32.totalorder %s16_s17, 4   ;;  %s1260_s13 = smov %s966_s14 }
 0x28f   : > { %s1261_s14 = smov %s1059_s25  ;;  %s1262_s15 = smov %s974_s16 }
 0x290   : > { %s1263_s16 = smov %s1265_s20  ;;  %15 = sbr.rel (!%p13_p3) target bundleno = 4 (0x4), region = 70 }
 0x295   :  { %714 = vsyncpa [#allocation3], 1 }
 0x296   :  { %716 = vsyncpa [#allocation3 + $0x1], 1 }

// kernel: tpu_custom_call.1
= control target key start
LH: loop header
LB: loop body
LE: loop exit
PB: predicated region body
PF: predicated region fallthrough
CT: control target
= control target key end

     0   :  { %8 = vsyncpa [#allocation3], 0  ;;  %s1253_s0 = inlined_call_operand.vmem [shape: f32[2,136,64], index: 0, kind: input, shape index: {}]   ;;  %s1254_s1 = inlined_call_operand.vmem [shape: f32[2,136,64], index: 1, kind: input, shape index: {}]   ;;  %s1255_s2 = inlined_call_operand.vmem [shape: bf16[1,144,64], index: 2, kind: input, shape index: {}]   ;;  %s1256_s3 = inlined_call_operand.hbm [shape: f32[2,48,128], index: 3, kind: output, shape index: {}]  }
   0x1   :  { %10 = vsyncpa [#allocation3 + $0x1], 0  ;;  %s1006_s12 = smov 0   ;;  %s1008_s13 = smov 0  }
   0x2   :  { %s1010_s14 = smov 0   ;;  %s1012_s15 = smov 0  }
   0x3   :  { %s1014_s16 = smov 0   ;;  %s1016_s17 = smov 0  }
   0x4 LB: > { %s789_s18 = sadd.s32 4294967295, %s978_s17   ;;  %s790_s19 = sadd.s32 4294967294, %s978_s17   ;;  %s978_s17 = sphi %s1016_s17, %s16_s17   ;;  %s974_s16 = sphi %s1014_s16, %s1263_s16   ;;  %s970_s15 = sphi %s1012_s15, %s1262_s15   ;;  %s966_s14 = sphi %s1010_s14, %s1261_s14   ;;  %s962_s13 = sphi %s1008_s13, %s1260_s13   ;;  %s958_s12 = sphi %s1006_s12, %s1259_s12  }
   0x5   : > { %s28_s20 = sadd.s32 1, %s974_s16  ;;  %s118_s21 = sadd.s32 1, %s966_s14 }
   0x6   : > { %p30_p0 = scmp.ge.s32.totalorder %s28_s20, 2  ;;  %p128_p1 = scmp.ne.s32.totalorder %s966_s14, %s962_s13 }
   0x7   : > { %p129_p2 = scmp.eq.s32.totalorder %s789_s18, 1  ;;  %p134_p3 = scmp.ne.s32.totalorder %s962_s13, %s958_s12 }
   0x8   : > { %s1265_s20 = smov (%p30_p0, %s28_s20), 0  ;;  %p135_p5 = scmp.eq.s32.totalorder %s790_s19, 1 }
   0x9   : > { %p1046_p4 = por %p129_p2, %p128_p1  ;;  %s113_s23 = ssub.s32 %s974_s16, %s1265_s20 }
   0xa   : > { %p793_p6 = scmp.ge.s32.totalorder %s978_s17, 1  ;;  %p116_p7 = scmp.eq.s32.totalorder %s113_s23, 0 }
   0xb   : > { %p1053_p8 = por %p135_p5, %p134_p3  ;;  %p192_p9 = scmp.lt.s32.totalorder %s978_s17, 3 }
   0xc   : > { %s1059_s25 = scalar_select %p116_p7, %s966_s14, %s118_s21  }
   0xd   : > { %p193_p10 = pnand %p793_p6, %p192_p9 }
   0xe   : > { %p239_p11 = scmp.lt.s32.totalorder (!%p193_p10), %s970_s15, 1  ;;  %s981_s9 = smov (!%p193_p10), 127  }
   0xf   : > { %196 = sbr.rel (%p193_p10) target bundleno = 646 (0x286), region = 32  ;;  %s982_s10 = smov (!%p193_p10), 126  }
  0x10   : > { %s231_s11 = sand.u32 (!%p193_p10), 1, %s962_s13   ;;  %s830_s21 = smul.u32 (!%p193_p10), 768, %s970_s15 }
  0x11   : > { %s827_s18 = smul.u32 (!%p193_p10), 48, %s231_s11  ;;  %s983_s30 = smov (!%p193_p10), [#allocation2]  }
  0x13   : > { %s1178_s19 = scalar_lea.vmem (!%p193_p10), [#allocation2], %s827_s18 }
  0x14   : > { %s240_s26 = scalar_select %p239_p11, %s970_s15, 1  ;;  %v980_v13 = vmov 0   ;;  %v893_v42 = vld [vmem:[%s1255_s2 + $0x28] sm:$0xff]   ;;  %v895_v43 = vld [vmem:[%s1255_s2] sm:$0xff]   ;;  %vm417_vm0 = vcmask 523264   ;;  %v894_v44 = vld [vmem:[%s1255_s2 + $0x30] sm:$0xff]  }
  0x15   : > { %521 = vmatprep.mubr.bf16.mxu1 %v980_v13  ;;  %477 = vmatprep.mubr.bf16.mxu0 %v980_v13  ;;  %v896_v45 = vld [vmem:[%s1255_s2 + $0x8] sm:$0xff]   ;;  %v897_v46 = vld [vmem:[%s1255_s2 + $0x38] sm:$0xff]   ;;  %v898_v47 = vld [vmem:[%s1255_s2 + $0x10] sm:$0xff]   ;;  %vm598_vm1 = vcmask 1039360   ;;  %vm653_vm2 = vcmask 1031168   ;;  %s693_s23 = sshll.u32 %s1178_s19, 4  ;;  %s1202_s23 = int_to_ptr.vmem [resolvable:$true] %s693_s23 }
  0x16   : > { %s828_s27 = smul.u32 136, %s240_s26  ;;  %v899_v48 = vld [vmem:[%s1255_s2 + $0x18] sm:$0xff]   ;;  %v900_v49 = vld [vmem:[%s1255_s2 + $0x40] sm:$0xff]   ;;  %s1208_s15 = scalar_lea.sflag [#allocation3], %s231_s11 }
  0x17   : > { %v901_v50 = vld [vmem:[%s1255_s2 + $0x20] sm:$0xff]   ;;  %s902_s29 = scalar_lea.vmem %s1202_s23, 768 }
  0x18   : > { %s818_s28 = sadd.s32 128, %s828_s27  ;;  %s1069_s7 = scalar_lea.vmem %s1253_s0, %s828_s27 }
  0x19   : > { %s261_s4 = scalar_lea.vmem %s1254_s1, %s818_s28  ;;  %v265_v1 = vld [vmem:[%s1069_s7] sm:$0xff]  ;;  %v266_v2 = vld [vmem:[%s1069_s7 + $0x8] sm:$0xff]  ;;  %v267_v3 = vld [vmem:[%s1069_s7 + $0x10] sm:$0xff]  ;;  %s1200_s28 = scalar_lea.hbm %s1256_s3, %s830_s21 }
  0x1a   : > { %v281_v0 = vld [vmem:[%s261_s4] sm:$0xff]  ;;  %v268_v4 = vld [vmem:[%s1069_s7 + $0x18] sm:$0xff]  ;;  %v270_v6 = vld [vmem:[%s1069_s7 + $0x28] sm:$0xff]  ;;  %p903_p12 = scmp.ne.s32.totalorder %s1202_s23, %s902_s29  ;;  %s906_s4 = sshll.u32 %s983_s30, 4  ;;  %s907_s4 = int_to_ptr.vmem [resolvable:$false] %s906_s4 }
  0x1b   : > { %314 = vxpose.xlu0.b32.start.end [1/1] (short) (narrow) %v281_v0, 64  ;;  %v269_v5 = vld [vmem:[%s1069_s7 + $0x20] sm:$0xff]  ;;  %v271_v7 = vld [vmem:[%s1069_s7 + $0x30] sm:$0xff]  ;;  %v272_v8 = vld [vmem:[%s1069_s7 + $0x38] sm:$0xff]  ;;  %s908_s5 = scalar_lea.vmem %s907_s4, 1536  ;;  %p909_p1 = scmp.lt.s32.totalorder %s1202_s23, %s907_s4 }
  0x1c   : > { %v273_v9 = vld [vmem:[%s1069_s7 + $0x40] sm:$0xff]  ;;  %v274_v10 = vld [vmem:[%s1069_s7 + $0x48] sm:$0xff]  ;;  %v275_v11 = vld [vmem:[%s1069_s7 + $0x50] sm:$0xff]  ;;  %p904_p13 = pnand %p903_p12, %p1046_p4  ;;  %p910_p2 = scmp.lt.s32.totalorder %s908_s5, %s902_s29 }
  0x1d   : > { %v276_v12 = vld [vmem:[%s1069_s7 + $0x58] sm:$0xff]  ;;  %v277_v14 = vld [vmem:[%s1069_s7 + $0x60] sm:$0xff]  ;;  %v278_v15 = vld [vmem:[%s1069_s7 + $0x68] sm:$0xff] }
  0x1e   : > { %v279_v16 = vld [vmem:[%s1069_s7 + $0x70] sm:$0xff]  ;;  %v280_v17 = vld [vmem:[%s1069_s7 + $0x78] sm:$0xff]  ;;  %p905_p0 = pneg %p904_p13  ;;  %p911_p3 = por %p910_p2, %p909_p1 }
  0x20   : > { %p912_p5 = pnand %p911_p3, %p905_p0 }
  0x38   : > { %282 = vxpose.xlu0.b32.start [1/16] (narrow) %v265_v1, 64 }
  0x3c   : > { %283 = vxpose.xlu0.b32.cont [2/16] (narrow) %v266_v2, 64 }
  0x40   : > { %284 = vxpose.xlu0.b32.cont [3/16] (narrow) %v267_v3, 64 }
  0x44   : > { %285 = vxpose.xlu0.b32.cont [4/16] (narrow) %v268_v4, 64 }
  0x48   : > { %286 = vxpose.xlu0.b32.cont [5/16] (narrow) %v269_v5, 64 }
  0x4c   : > { %287 = vxpose.xlu0.b32.cont [6/16] (narrow) %v270_v6, 64 }
  0x50   : > { %288 = vxpose.xlu0.b32.cont [7/16] (narrow) %v271_v7, 64 }
  0x54   : > { %289 = vxpose.xlu0.b32.cont [8/16] (narrow) %v272_v8, 64 }
  0x58   : > { %290 = vxpose.xlu0.b32.cont [9/16] (narrow) %v273_v9, 64 }
  0x5c   : > { %291 = vxpose.xlu0.b32.cont [10/16] (narrow) %v274_v10, 64 }
  0x60   : > { %292 = vxpose.xlu0.b32.cont [11/16] (narrow) %v275_v11, 64 }
  0x64   : > { %293 = vxpose.xlu0.b32.cont [12/16] (narrow) %v276_v12, 64 }
  0x68   : > { %294 = vxpose.xlu0.b32.cont [13/16] (narrow) %v277_v14, 64 }
  0x6c   : > { %295 = vxpose.xlu0.b32.cont [14/16] (narrow) %v278_v15, 64 }
  0x70   : > { %296 = vxpose.xlu0.b32.cont [15/16] (narrow) %v279_v16, 64 }
  0x74   : > { %297 = vxpose.xlu0.b32.end [16/16] (narrow) %v280_v17, 64 }
  0x97   : > { %v330_v18 = vpop.trf.xlu0 }
  0x9b   : > { %v331_v19 = vpop.trf.xlu0 }
  0x9c   : > { %v347_v20 = vpack.c.bf16 %v331_v19, %v330_v18 }
  0x9f   : > { %v332_v21 = vpop.trf.xlu0 }
  0xa3   : > { %v333_v22 = vpop.trf.xlu0 }
  0xa4   : > { %v349_v39 = vpack.c.bf16 %v333_v22, %v332_v21 }
  0xa7   : > { %v334_v23 = vpop.trf.xlu0 }
  0xab   : > { %v335_v24 = vpop.trf.xlu0 }
  0xac   : > { %v351_v37 = vpack.c.bf16 %v335_v24, %v334_v23 }
  0xaf   : > { %v336_v25 = vpop.trf.xlu0 }
  0xb3   : > { %v337_v26 = vpop.trf.xlu0 }
  0xb4   : > { %v353_v27 = vpack.c.bf16 %v337_v26, %v336_v25 }
  0xb6   : > { %453 = vmatprep.subr.bf16.mxu0 %v353_v27  ;;  %819 = vmatprep.subr.bf16.mxu1 %v353_v27 }
  0xb7   : > { %v298_v28 = vpop.trf.xlu0 }
  0xbb   : > { %v299_v29 = vpop.trf.xlu0 }
  0xbc   : > { %v346_v41 = vpack.c.bf16 %v299_v29, %v298_v28 }
  0xbf   : > { %v300_v30 = vpop.trf.xlu0 }
  0xc3   : > { %v301_v31 = vpop.trf.xlu0 }
  0xc4   : > { %v348_v40 = vpack.c.bf16 %v301_v31, %v300_v30 }
  0xc7   : > { %v302_v32 = vpop.trf.xlu0 }
  0xcb   : > { %v303_v33 = vpop.trf.xlu0 }
  0xcc   : > { %v350_v38 = vpack.c.bf16 %v303_v33, %v302_v32 }
  0xcf   : > { %v304_v34 = vpop.trf.xlu0 }
  0xd3   : > { %v305_v35 = vpop.trf.xlu0 }
  0xd4   : > { %v352_v36 = vpack.c.bf16 %v305_v35, %v304_v34 }
  0xd6   : > { %454 = vmatpush1.bf16.msra.mxu0 %v352_v36  ;;  %823 = vmatpush1.bf16.msra.mxu1 %v352_v36 }
  0xd7   : > { %455 = vmatprep.subr.bf16.mxu0 %v351_v37  ;;  %820 = vmatprep.subr.bf16.mxu1 %v351_v37 }
  0xda   : > { %456 = vmatpush1.bf16.msra.mxu0 %v350_v38  ;;  %824 = vmatpush1.bf16.msra.mxu1 %v350_v38 }
  0xdb   : > { %457 = vmatprep.subr.bf16.mxu0 %v349_v39  ;;  %821 = vmatprep.subr.bf16.mxu1 %v349_v39 }
  0xde   : > { %458 = vmatpush1.bf16.msra.mxu0 %v348_v40  ;;  %825 = vmatpush1.bf16.msra.mxu1 %v348_v40 }
  0xdf   : > { %459 = vmatprep.subr.bf16.mxu0 %v347_v20  ;;  %822 = vmatprep.subr.bf16.mxu1 %v347_v20 }
  0xe2   : > { %460 = vmatpush1.bf16.msra.mxu0 %v346_v41  ;;  %826 = vmatpush1.bf16.msra.mxu1 %v346_v41 }
  0xe5   : > { %810 = vmatmul.mubr.msk.bf16.vlgmr.msra.gmra.mxu1 %vm417_vm0, %v893_v42  ;;  %805 = vmatmul.mubr.msk.bf16.vlgmr.msra.gmra.mxu0 %vm417_vm0, %v895_v43 }
  0xe6   : > { %531 = vmatprep.mubr.bf16.mxu1 %v980_v13  ;;  %485 = vmatprep.mubr.bf16.mxu0 %v980_v13 }
  0xed   : > { %811 = vmatmul.mubr.msk.bf16.gmra.mxu1 %vm417_vm0, %v894_v44  ;;  %806 = vmatmul.mubr.msk.bf16.gmra.mxu0 %vm417_vm0, %v896_v45 }
  0xee   : > { %541 = vmatprep.mubr.bf16.mxu1 %v980_v13  ;;  %493 = vmatprep.mubr.bf16.mxu0 %v980_v13 }
  0xf5   : > { %812 = vmatmul.mubr.msk.bf16.gmra.mxu1 %vm417_vm0, %v897_v46  ;;  %807 = vmatmul.mubr.msk.bf16.gmra.mxu0 %vm417_vm0, %v898_v47 }
  0xf6   : > { %501 = vmatprep.mubr.bf16.mxu0 %v980_v13  ;;  %551 = vmatprep.mubr.bf16.mxu1 %v980_v13 }
  0xfd   : > { %808 = vmatmul.mubr.msk.bf16.gmra.mxu0 %vm417_vm0, %v899_v48  ;;  %813 = vmatmul.mubr.msk.bf16.gmra.mxu1 %vm417_vm0, %v900_v49 }
  0xfe   : > { %511 = vmatprep.mubr.bf16.mxu0 %v980_v13 }
 0x105   : > { %809 = vmatmul.mubr.msk.bf16.gmra.mxu0 %vm417_vm0, %v901_v50 }
 0x1a5   : > { %v523_v51 = vpop.f32.mrf.mxu1  ;;  %v1132_v52 = vpop.f32.mrf.mxu0 }
 0x1a6   : > { %590 = vrot.lane.b32.xlu1 %v523_v51, %s981_s9 }
 0x1a7   : > { %v481_v53 = vpop.f32.mrf.mxu0  ;;  %v525_v54 = vpop.f32.mrf.mxu1 }
 0x1a9   : > { %v1135_v55 = vpop.f32.mrf.mxu0  ;;  %v527_v57 = vpop.f32.mrf.mxu1 }
 0x1aa   : > { %592 = vrot.lane.b32.xlu1 %v525_v54, %s981_s9 }
 0x1ab   : > { %v484_v56 = vpop.f32.mrf.mxu0  ;;  %v529_v60 = vpop.f32.mrf.mxu1 }
 0x1ad   : > { %v1138_v58 = vpop.f32.mrf.mxu0  ;;  %v533_v63 = vpop.f32.mrf.mxu1 }
 0x1ae   : > { %594 = vrot.lane.b32.xlu1 %v527_v57, %s981_s9 }
 0x1af   : > { %v489_v59 = vpop.f32.mrf.mxu0  ;;  %v535_v2 = vpop.f32.mrf.mxu1 }
 0x1b1   : > { %v1141_v61 = vpop.f32.mrf.mxu0  ;;  %v537_v5 = vpop.f32.mrf.mxu1 }
 0x1b2   : > { %596 = vrot.lane.b32.xlu1 %v529_v60, %s981_s9 }
 0x1b3   : > { %v492_v62 = vpop.f32.mrf.mxu0  ;;  %v539_v6 = vpop.f32.mrf.mxu1 }
 0x1b5   : > { %v1144_v0 = vpop.f32.mrf.mxu0  ;;  %v543_v7 = vpop.f32.mrf.mxu1 }
 0x1b6   : > { %629 = vrot.lane.b32.xlu1 %v533_v63, %s982_s10 }
 0x1b7   : > { %v497_v1 = vpop.f32.mrf.mxu0  ;;  %v545_v8 = vpop.f32.mrf.mxu1 }
 0x1b9   : > { %v1147_v3 = vpop.f32.mrf.mxu0  ;;  %v547_v9 = vpop.f32.mrf.mxu1 }
 0x1ba   : > { %631 = vrot.lane.b32.xlu1 %v535_v2, %s982_s10 }
 0x1bb   : > { %v500_v4 = vpop.f32.mrf.mxu0  ;;  %v549_v10 = vpop.f32.mrf.mxu1 }
 0x1bd   : > { %v503_v11 = vpop.f32.mrf.mxu0  ;;  %v553_v12 = vpop.f32.mrf.mxu1 }
 0x1be   : > { %633 = vrot.lane.b32.xlu1 %v537_v5, %s982_s10 }
 0x1bf   : > { %v505_v13 = vpop.f32.mrf.mxu0  ;;  %v555_v14 = vpop.f32.mrf.mxu1 }
 0x1c1   : > { %v507_v15 = vpop.f32.mrf.mxu0  ;;  %v557_v16 = vpop.f32.mrf.mxu1 }
 0x1c2   : > { %635 = vrot.lane.b32.xlu1 %v539_v6, %s982_s10 }
 0x1c3   : > { %v509_v17 = vpop.f32.mrf.mxu0  ;;  %v559_v22 = vpop.f32.mrf.mxu1 }
 0x1c5   : > { %v513_v18 = vpop.f32.mrf.mxu0 }
 0x1c6   : > { %637 = vrot.lane.b32.xlu1 %v543_v7, %s982_s10 }
 0x1c7   : > { %v515_v19 = vpop.f32.mrf.mxu0 }
 0x1c9   : > { %v517_v20 = vpop.f32.mrf.mxu0 }
 0x1ca   : > { %639 = vrot.lane.b32.xlu1 %v545_v8, %s982_s10 }
 0x1cb   : > { %v519_v21 = vpop.f32.mrf.mxu0 }
 0x1ce   : > { %641 = vrot.lane.b32.xlu1 %v547_v9, %s982_s10 }
 0x1d2   : > { %643 = vrot.lane.b32.xlu1 %v549_v10, %s982_s10 }
 0x1d6   : > { %574 = vrot.lane.b32.xlu1 %v503_v11, %s981_s9 }
 0x1da   : > { %645 = vrot.lane.b32.xlu1 %v553_v12, %s982_s10 }
 0x1de   : > { %576 = vrot.lane.b32.xlu1 %v505_v13, %s981_s9 }
 0x1e2   : > { %647 = vrot.lane.b32.xlu1 %v555_v14, %s982_s10 }
 0x1e6   : > { %578 = vrot.lane.b32.xlu1 %v507_v15, %s981_s9 }
 0x1ea   : > { %649 = vrot.lane.b32.xlu1 %v557_v16, %s982_s10 }
 0x1ee   : > { %580 = vrot.lane.b32.xlu1 %v509_v17, %s981_s9 }
 0x1f2   : > { %582 = vrot.lane.b32.xlu1 %v513_v18, %s981_s9 }
 0x1f6   : > { %584 = vrot.lane.b32.xlu1 %v515_v19, %s981_s9 }
 0x1fa   : > { %586 = vrot.lane.b32.xlu1 %v517_v20, %s981_s9 }
 0x1fe   : > { %588 = vrot.lane.b32.xlu1 %v519_v21, %s981_s9 }
 0x202   : > { %651 = vrot.lane.b32.xlu1 %v559_v22, %s982_s10 }
 0x218   : > { %v591_v23 = vpop.permute.xlu1 %590 }
 0x21c   : > { %v593_v24 = vpop.permute.xlu1 %592 }
 0x21d   : > { %v603_v39 = vsel %vm598_vm1, %v591_v23, %v593_v24 }
 0x21e   : > { %v615_v43 = vadd.f32 %v603_v39, %v1144_v0 }
 0x220   : > { %v595_v25 = vpop.permute.xlu1 %594 }
 0x224   : > { %v597_v26 = vpop.permute.xlu1 %596 }
 0x225   : > { %v604_v27 = vsel %vm598_vm1, %v595_v25, %v597_v26 }
 0x228   : > { %v630_v28 = vpop.permute.xlu1 %629 }
 0x22c   : > { %v632_v29 = vpop.permute.xlu1 %631 }
 0x22d   : > { %v654_v42 = vsel %vm653_vm2, %v630_v28, %v632_v29 }
 0x230   : > { %v634_v30 = vpop.permute.xlu1 %633 }
 0x234   : > { %v636_v31 = vpop.permute.xlu1 %635 }
 0x235   : > { %v655_v53 = vsel %vm653_vm2, %v634_v30, %v636_v31 }
 0x238   : > { %v638_v32 = vpop.permute.xlu1 %637 }
 0x23c   : > { %v640_v33 = vpop.permute.xlu1 %639 }
 0x23d   : > { %v656_v62 = vsel %vm653_vm2, %v638_v32, %v640_v33 }
 0x240   : > { %v642_v34 = vpop.permute.xlu1 %641 }
 0x244   : > { %v644_v35 = vpop.permute.xlu1 %643 }
 0x245   : > { %v657_v4 = vsel %vm653_vm2, %v642_v34, %v644_v35 }
 0x248   : > { %v575_v36 = vpop.permute.xlu1 %574 }
 0x24c   : > { %v646_v37 = vpop.permute.xlu1 %645 }
 0x250   : > { %v577_v38 = vpop.permute.xlu1 %576 }
 0x251   : > { %v599_v40 = vsel %vm598_vm1, %v575_v36, %v577_v38 }
 0x252   : > { %v611_v41 = vadd.f32 %v599_v40, %v1132_v52 }
 0x254   : > { %v666_v44 = vadd.f32 %v654_v42, %v611_v41  ;;  %v648_v45 = vpop.permute.xlu1 %647 }
 0x255   : > { %v658_v46 = vsel %vm653_vm2, %v646_v37, %v648_v45 }
 0x256   : > { %672 = vst [vmem:[%s1178_s19] sm:$0xff] %v666_v44  ;;  %v670_v47 = vadd.f32 %v658_v46, %v615_v43 }
 0x258   : > { %676 = vst [vmem:[%s1178_s19 + $0x20] sm:$0xff] %v670_v47  ;;  %v579_v48 = vpop.permute.xlu1 %578 }
 0x25c   : > { %v650_v49 = vpop.permute.xlu1 %649 }
 0x260   : > { %v581_v50 = vpop.permute.xlu1 %580 }
 0x261   : > { %v600_v51 = vsel %vm598_vm1, %v579_v48, %v581_v50 }
 0x262   : > { %v612_v52 = vadd.f32 %v600_v51, %v1135_v55 }
 0x264   : > { %v667_v54 = vadd.f32 %v655_v53, %v612_v52  ;;  %v583_v56 = vpop.permute.xlu1 %582 }
 0x266   : > { %673 = vst [vmem:[%s1178_s19 + $0x8] sm:$0xff] %v667_v54 }
 0x268   : > { %v585_v57 = vpop.permute.xlu1 %584 }
 0x269   : > { %v601_v59 = vsel %vm598_vm1, %v583_v56, %v585_v57 }
 0x26a   : > { %v613_v60 = vadd.f32 %v601_v59, %v1138_v58  ;;  %v616_v58 = vadd.f32 %v604_v27, %v1147_v3 }
 0x26c   : > { %v668_v63 = vadd.f32 %v656_v62, %v613_v60  ;;  %v587_v0 = vpop.permute.xlu1 %586 }
 0x26e   : > { %674 = vst [vmem:[%s1178_s19 + $0x10] sm:$0xff] %v668_v63 }
 0x270   : > { %v589_v55 = vpop.permute.xlu1 %588 }
 0x271   : > { %v602_v1 = vsel %vm598_vm1, %v587_v0, %v589_v55 }
 0x272   : > { %v614_v2 = vadd.f32 %v602_v1, %v1141_v61 }
 0x274   : > { %v669_v5 = vadd.f32 %v657_v4, %v614_v2  ;;  %v652_v6 = vpop.permute.xlu1 %651 }
 0x275   : > { %v659_v7 = vsel %vm653_vm2, %v650_v49, %v652_v6 }
 0x276   : > { %675 = vst [vmem:[%s1178_s19 + $0x18] sm:$0xff] %v669_v5  ;;  %v671_v61 = vadd.f32 %v659_v7, %v616_v58 }
 0x278   : > { %677 = vst [vmem:[%s1178_s19 + $0x28] sm:$0xff] %v671_v61 }
 0x279   : > { %915 = shalt.err (!%p912_p5)
}
 0x27a   : > { %s916_s6 = scalar_lea.hbm %s1200_s28, 768  ;;  %s920_s9 = scalar_lea.hbm %s1256_s3, 1536 }
 0x27b   : > { %p917_p6 = scmp.ne.s32.totalorder %s1200_s28, %s916_s6  ;;  %p921_p10 = scmp.lt.s32.totalorder %s1200_s28, %s1256_s3 }
 0x27c   : > { %p922_p11 = scmp.lt.s32.totalorder %s920_s9, %s916_s6 }
 0x27d   : > { %p918_p7 = pnand %p917_p6, %p1046_p4 }
 0x27e   : > { %p923_p12 = por %p922_p11, %p921_p10 }
 0x27f   : > { %p919_p9 = pneg %p918_p7 }
 0x281   : > { %p924_p13 = pnand %p923_p12, %p919_p9 }
 0x283   : > { %927 = shalt.err (!%p924_p13)
}
 0x284   : > { %s984_s18 = smov 128   ;;  %s985_s19 = smov 8  }
 0x285   : > { %831 = dma.vmem_to_hbm [thread:$0]  (%p1046_p4), %s1202_s23, 768, %s1200_s28, %s1208_s15, %s984_s18, %s984_s18, %s985_s19  }
 0x286 PF: > { %p838_p0 = scmp.ge.s32.totalorder %s978_s17, 2  ;;  %s708_s21 = sand.u32 1, %s958_s12  }
 0x287   : > { %s709_s26 = scalar_lea.sflag [#allocation3], %s708_s21 }
 0x288   : > { %p834_p1 = pnand %p838_p0, %p1053_p8 }
 0x28a   : > { %p835_p2 = pneg %p834_p1 }
 0x28c   : > { %953 = dma.done.wait (%p835_p2), %s709_s26, 768  }
 0x28d   : > { %955 = vsyncadd (%p835_p2), %s709_s26, 4294966528  ;;  %s16_s17 = sadd.s32 1, %s978_s17   ;;  %s1259_s12 = smov %s962_s13 }
 0x28e   : > { %p13_p3 = scmp.ge.s32.totalorder %s16_s17, 4   ;;  %s1260_s13 = smov %s966_s14 }
 0x28f   : > { %s1261_s14 = smov %s1059_s25  ;;  %s1262_s15 = smov %s974_s16 }
 0x290   : > { %s1263_s16 = smov %s1265_s20  ;;  %15 = sbr.rel (!%p13_p3) target bundleno = 4 (0x4), region = 70 }
 0x295   :  { %714 = vsyncpa [#allocation3], 1 }
 0x296   :  { %716 = vsyncpa [#allocation3 + $0x1], 1 }

</bundles_post_ra>
